<compile_context>
chip_gen: v7x
topology: tpu7x:2x2x1
jax: 0.10.0
libtpu: 0.0.40
codegen_flags: <defaults>
</compile_context>

<pallas_src>
import jax
import jax.numpy as jnp
from jax import lax
from jax.experimental import pallas as pl
from jax.experimental.pallas import tpu as pltpu

EPS = 1e-5  # matches calc_mean_std eps in the reference AdaIN implementation
VMEM_LIMIT = 32 * 1024 * 1024  # safe scoped limit on v5e/v6e (128 MiB) and v7x (64 MiB)


# ----------------------------------------------------------------------------
# tiling helpers
# ----------------------------------------------------------------------------
def _round_up(x, m):
    return (x + m - 1) // m * m


def _spatial_tiling(hw, max_tile=16384):
    """Return (s_tile, hw_padded).

    s_tile is either the full hw (single block) or a lane-aligned (multiple of
    128) tile; if hw has no suitable divisor it is zero-padded up to a tile
    multiple (statistics are corrected on the host).
    """
    max_tile = max(128, max_tile)
    if hw <= max_tile:
        return hw, hw
    t = (max_tile // 128) * 128
    while t >= 128:
        if hw % t == 0:
            return t, hw
        t -= 128
    t = (max_tile // 128) * 128
    return t, _round_up(hw, t)


def _pad_spatial(x3, hw_pad):
    hw = x3.shape[-1]
    if hw_pad == hw:
        return x3
    return jnp.pad(x3, ((0, 0), (0, 0), (0, hw_pad - hw)))


# ----------------------------------------------------------------------------
# kernel 1: vgg features (MXU) + per-(n,c) sum / sum-of-squares for content
#           and style in one body (no host-side concat)
# ----------------------------------------------------------------------------
def _stats_kernel(xc_ref, xs_ref, wvT_ref, bv_ref,
                  c_sum_ref, c_sq_ref, s_sum_ref, s_sq_ref):
    s_idx = pl.program_id(1)

    @pl.when(s_idx == 0)
    def _():
        c_sum_ref[...] = jnp.zeros_like(c_sum_ref)
        c_sq_ref[...] = jnp.zeros_like(c_sq_ref)
        s_sum_ref[...] = jnp.zeros_like(s_sum_ref)
        s_sq_ref[...] = jnp.zeros_like(s_sq_ref)

    wvT = wvT_ref[...]                                   # (C_FEAT, Cin)
    bv = bv_ref[...]                                     # (C_FEAT, 1)

    def accum(x_ref, sum_ref, sq_ref):
        x = x_ref[...].astype(jnp.float32)               # (Cin, S)
        feat = jnp.maximum(
            jnp.dot(wvT, x, preferred_element_type=jnp.float32) + bv, 0.0)
        sum_ref[...] += jnp.sum(feat, axis=-1, keepdims=True)
        sq_ref[...] += jnp.sum(feat * feat, axis=-1, keepdims=True)

    accum(xc_ref, c_sum_ref, c_sq_ref)
    accum(xs_ref, s_sum_ref, s_sq_ref)


# ----------------------------------------------------------------------------
# kernel 2: vgg(content) + (AdaIN+blend folded into decoder) per spatial tile
# ----------------------------------------------------------------------------
def _adain_dec_kernel(x_ref, wvT_ref, bv_ref, wd_ref, bd_ref, o_ref):
    x = x_ref[...].astype(jnp.float32)                   # (Cin, S)
    feat = jnp.maximum(
        jnp.dot(wvT_ref[...], x, preferred_element_type=jnp.float32)
        + bv_ref[...], 0.0)                              # (C_FEAT, S)
    out = jnp.dot(wd_ref[...], feat,
                  preferred_element_type=jnp.float32) + bd_ref[...]
    o_ref[...] = out.astype(o_ref.dtype)                 # lane-dense (Cout, S)


# ----------------------------------------------------------------------------
# AdaIN module forward: decoder(adain(vgg(content), vgg(style)) blended)
# ----------------------------------------------------------------------------
def adain_forward(params, content, style, alpha=1.0, max_tile=16384):
    N, Cin, H, W = content.shape
    HW = H * W
    C_FEAT = params["vgg_w"].shape[1]
    Cout = params["dec_w"].shape[1]

    s_tile, hw_pad = _spatial_tiling(HW, max_tile)
    n_s = hw_pad // s_tile
    n_pad = hw_pad - HW

    c3 = _pad_spatial(content.reshape(N, Cin, HW), hw_pad)
    s3 = _pad_spatial(style.reshape(N, Cin, HW), hw_pad)

    wvT = jnp.transpose(params["vgg_w"]).astype(jnp.float32)   # (C_FEAT, Cin)
    bv = params["vgg_b"].reshape(C_FEAT, 1).astype(jnp.float32)
    wdT = jnp.transpose(params["dec_w"]).astype(jnp.float32)   # (Cout, C_FEAT)
    bd = params["dec_b"].astype(jnp.float32)                   # (Cout,)

    # --- pass 1: per-(n,c) sum / sumsq of vgg features, content & style ------
    stats_out = pl.pallas_call(
        _stats_kernel,
        out_shape=tuple(jax.ShapeDtypeStruct((N, C_FEAT, 1), jnp.float32)
                        for _ in range(4)),
        grid=(N, n_s),
        in_specs=[
            pl.BlockSpec((None, Cin, s_tile), lambda n, s: (n, 0, s)),   # content
            pl.BlockSpec((None, Cin, s_tile), lambda n, s: (n, 0, s)),   # style
            pl.BlockSpec((C_FEAT, Cin), lambda n, s: (0, 0)),
            pl.BlockSpec((C_FEAT, 1), lambda n, s: (0, 0)),
        ],
        out_specs=[
            pl.BlockSpec((None, C_FEAT, 1), lambda n, s: (n, 0, 0)),  # c_sum
            pl.BlockSpec((None, C_FEAT, 1), lambda n, s: (n, 0, 0)),  # c_sumsq
            pl.BlockSpec((None, C_FEAT, 1), lambda n, s: (n, 0, 0)),  # s_sum
            pl.BlockSpec((None, C_FEAT, 1), lambda n, s: (n, 0, 0)),  # s_sumsq
        ],
        compiler_params=pltpu.CompilerParams(
            dimension_semantics=("parallel", "arbitrary"),
            vmem_limit_bytes=VMEM_LIMIT,
        ),
    )(c3, s3, wvT, bv)
    c_sum, c_sq, s_sum, s_sq = stats_out

    # Correct for zero-padded spatial columns: there feat == relu(bv) exactly.
    fpad = jnp.maximum(params["vgg_b"].astype(jnp.float32), 0.0)   # (C_FEAT,)
    pad_sum = n_pad * fpad
    pad_sq = n_pad * fpad * fpad
    denom = float(max(HW - 1, 1))   # torch.var default is unbiased (ddof=1)

    def moments(sums, sq):
        sums = sums[..., 0] - pad_sum                    # (N, C_FEAT)
        sq = sq[..., 0] - pad_sq
        mean = sums / HW
        # NOTE: one-pass variance in f32 can lose digits for large HW with
        # post-ReLU (large-mean) features; acceptable at eps=1e-5 tolerance.
        var = jnp.maximum((sq - HW * mean * mean) / denom, 0.0)
        return mean, var

    c_mean, c_var = moments(c_sum, c_sq)
    s_mean, s_var = moments(s_sum, s_sq)

    # Fold AdaIN + alpha blend into per-sample decoder weights (tiny host ops):
    #   decoder(feat*scale + shift) = (wdT*scale) @ feat + (wdT @ shift + bd)
    r = jnp.sqrt(s_var + EPS) * lax.rsqrt(c_var + EPS)   # (N, C_FEAT)
    scale = alpha * r + (1.0 - alpha)
    shift = alpha * (s_mean - c_mean * r)
    wd_n = wdT[None, :, :] * scale[:, None, :]           # (N, Cout, C_FEAT)
    bd_n = (jnp.einsum("of,nf->no", wdT, shift) + bd[None, :])[..., None]

    # --- pass 2: vgg(content) -> folded decoder, tiled over spatial ----------
    out3 = pl.pallas_call(
        _adain_dec_kernel,
        out_shape=jax.ShapeDtypeStruct((N, Cout, hw_pad), jnp.float32),
        grid=(N, n_s),
        in_specs=[
            pl.BlockSpec((None, Cin, s_tile), lambda n, s: (n, 0, s)),
            pl.BlockSpec((C_FEAT, Cin), lambda n, s: (0, 0)),
            pl.BlockSpec((C_FEAT, 1), lambda n, s: (0, 0)),
            pl.BlockSpec((None, Cout, C_FEAT), lambda n, s: (n, 0, 0)),
            pl.BlockSpec((None, Cout, 1), lambda n, s: (n, 0, 0)),
        ],
        out_specs=pl.BlockSpec((None, Cout, s_tile), lambda n, s: (n, 0, s)),
        compiler_params=pltpu.CompilerParams(
            dimension_semantics=("parallel", "parallel"),
            vmem_limit_bytes=VMEM_LIMIT,
        ),
    )(c3, wvT, bv, wd_n, bd_n)

    out3 = out3[:, :, :HW]
    return out3.reshape(N, Cout, H, W)


# ----------------------------------------------------------------------------
# pure-JAX reference (for correctness check)
# ----------------------------------------------------------------------------
def _reference(params, content, style, alpha=1.0):
    def vgg(x):
        y = jnp.einsum("nchw,cf->nfhw", x, params["vgg_w"])
        y = y + params["vgg_b"][None, :, None, None]
        return jnp.maximum(y, 0.0)

    cf = vgg(content)
    sf = vgg(style)

    def stats(f):
        m = f.mean(axis=(2, 3), keepdims=True)
        v = f.var(axis=(2, 3), keepdims=True, ddof=1)
        return m, jnp.sqrt(v + EPS)

    cm, cs = stats(cf)
    sm, ss = stats(sf)
    feat = (cf - cm) / cs * ss + sm
    feat = alpha * feat + (1.0 - alpha) * cf
    out = jnp.einsum("nfhw,fc->nchw", feat, params["dec_w"])
    return out + params["dec_b"][None, :, None, None]


if __name__ == "__main__":
    key = jax.random.PRNGKey(0)
    k_c, k_s, k_vw, k_vb, k_dw, k_db = jax.random.split(key, 6)

    N, C_IN, C_FEAT = 2, 3, 64

    params = {
        "vgg_w": 0.1 * jax.random.normal(k_vw, (C_IN, C_FEAT), dtype=jnp.float32),
        "vgg_b": 0.01 * jax.random.normal(k_vb, (C_FEAT,), dtype=jnp.float32),
        "dec_w": 0.1 * jax.random.normal(k_dw, (C_FEAT, C_IN), dtype=jnp.float32),
        "dec_b": 0.01 * jax.random.normal(k_db, (C_IN,), dtype=jnp.float32),
    }

    def check(h, w, alpha, max_tile, kk):
        kc, ks = jax.random.split(kk)
        content = jax.random.normal(kc, (N, C_IN, h, w), dtype=jnp.float32)
        style = jax.random.normal(ks, (N, C_IN, h, w), dtype=jnp.float32)
        out = adain_forward(params, content, style, alpha=alpha, max_tile=max_tile)
        jax.block_until_ready(out)
        assert out.shape == (N, C_IN, h, w)
        ref = _reference(params, content, style, alpha=alpha)
        err = float(jnp.max(jnp.abs(out - ref)))
        assert err < 1e-3, f"shape=({h},{w}) alpha={alpha}: max abs error {err}"

    k1, k2, k3 = jax.random.split(k_c, 3)
    check(16, 16, 1.0, 16384, k1)   # single spatial tile (stand-in for 512x512)
    check(16, 32, 0.7, 128, k2)     # multi-tile reduction + alpha-blend fold
    check(20, 20, 1.0, 128, k3)     # non-128-divisible HW -> padded-tail path

    print("KERNEL_OK")
</pallas_src>

<mosaic_0001>
module attributes {stable_mosaic.version = 11 : i64} {
  func.func @_stats_kernel(%arg0: i32, %arg1: i32, %arg2: memref<1x3x256xf32, #tpu.memory_space<vmem>>, %arg3: memref<1x3x256xf32, #tpu.memory_space<vmem>>, %arg4: memref<64x3xf32, #tpu.memory_space<vmem>>, %arg5: memref<64x1xf32, #tpu.memory_space<vmem>>, %arg6: memref<1x64x1xf32, #tpu.memory_space<vmem>>, %arg7: memref<1x64x1xf32, #tpu.memory_space<vmem>>, %arg8: memref<1x64x1xf32, #tpu.memory_space<vmem>>, %arg9: memref<1x64x1xf32, #tpu.memory_space<vmem>>) attributes {dimension_semantics = [#tpu.dimension_semantics<parallel>, #tpu.dimension_semantics<arbitrary>], iteration_bounds = array<i64: 2, 1>, scalar_prefetch = 0 : i64, scratch_operands = 0 : i64, tpu.core_type = #tpu.core_type<tc>, window_params = [{transform_indices = @transform_0, window_bounds = array<i64: 1, 3, 256>}, {transform_indices = @transform_1, window_bounds = array<i64: 1, 3, 256>}, {pipeline_mode = #tpu.pipeline_mode<synchronous>, transform_indices = @transform_2, window_bounds = array<i64: 64, 3>}, {pipeline_mode = #tpu.pipeline_mode<synchronous>, transform_indices = @transform_3, window_bounds = array<i64: 64, 1>}, {transform_indices = @transform_4, window_bounds = array<i64: 1, 64, 1>}, {transform_indices = @transform_5, window_bounds = array<i64: 1, 64, 1>}, {transform_indices = @transform_6, window_bounds = array<i64: 1, 64, 1>}, {transform_indices = @transform_7, window_bounds = array<i64: 1, 64, 1>}]} {
    %c0_i32 = arith.constant 0 : i32
    %0 = arith.cmpi eq, %arg1, %c0_i32 : i32
    %1 = arith.extui %0 : i1 to i32
    %c0_i32_0 = arith.constant 0 : i32
    %2 = arith.cmpi ne, %1, %c0_i32_0 : i32
    scf.if %2 {
      %cst_41 = arith.constant 0.000000e+00 : f32
      %53 = vector.broadcast %cst_41 : f32 to vector<64x1xf32>
      %c0_42 = arith.constant 0 : index
      %c0_43 = arith.constant 0 : index
      %c0_44 = arith.constant 0 : index
      %54 = vector.load %arg6[%c0_42, %c0_43, %c0_44] : memref<1x64x1xf32, #tpu.memory_space<vmem>>, vector<1x64x1xf32>
      %55 = vector.shape_cast %54 : vector<1x64x1xf32> to vector<64x1xf32>
      %56 = vector.shape_cast %53 : vector<64x1xf32> to vector<1x64x1xf32>
      tpu.vector_store %arg6[%c0_42, %c0_43, %c0_44], %56 {strides = array<i32>} : memref<1x64x1xf32, #tpu.memory_space<vmem>>, vector<1x64x1xf32>,
      %cst_45 = arith.constant 0.000000e+00 : f32
      %57 = vector.broadcast %cst_45 : f32 to vector<64x1xf32>
      %c0_46 = arith.constant 0 : index
      %c0_47 = arith.constant 0 : index
      %c0_48 = arith.constant 0 : index
      %58 = vector.load %arg7[%c0_46, %c0_47, %c0_48] : memref<1x64x1xf32, #tpu.memory_space<vmem>>, vector<1x64x1xf32>
      %59 = vector.shape_cast %58 : vector<1x64x1xf32> to vector<64x1xf32>
      %60 = vector.shape_cast %57 : vector<64x1xf32> to vector<1x64x1xf32>
      tpu.vector_store %arg7[%c0_46, %c0_47, %c0_48], %60 {strides = array<i32>} : memref<1x64x1xf32, #tpu.memory_space<vmem>>, vector<1x64x1xf32>,
      %cst_49 = arith.constant 0.000000e+00 : f32
      %61 = vector.broadcast %cst_49 : f32 to vector<64x1xf32>
      %c0_50 = arith.constant 0 : index
      %c0_51 = arith.constant 0 : index
      %c0_52 = arith.constant 0 : index
      %62 = vector.load %arg8[%c0_50, %c0_51, %c0_52] : memref<1x64x1xf32, #tpu.memory_space<vmem>>, vector<1x64x1xf32>
      %63 = vector.shape_cast %62 : vector<1x64x1xf32> to vector<64x1xf32>
      %64 = vector.shape_cast %61 : vector<64x1xf32> to vector<1x64x1xf32>
      tpu.vector_store %arg8[%c0_50, %c0_51, %c0_52], %64 {strides = array<i32>} : memref<1x64x1xf32, #tpu.memory_space<vmem>>, vector<1x64x1xf32>,
      %cst_53 = arith.constant 0.000000e+00 : f32
      %65 = vector.broadcast %cst_53 : f32 to vector<64x1xf32>
      %c0_54 = arith.constant 0 : index
      %c0_55 = arith.constant 0 : index
      %c0_56 = arith.constant 0 : index
      %66 = vector.load %arg9[%c0_54, %c0_55, %c0_56] : memref<1x64x1xf32, #tpu.memory_space<vmem>>, vector<1x64x1xf32>
      %67 = vector.shape_cast %66 : vector<1x64x1xf32> to vector<64x1xf32>
      %68 = vector.shape_cast %65 : vector<64x1xf32> to vector<1x64x1xf32>
      tpu.vector_store %arg9[%c0_54, %c0_55, %c0_56], %68 {strides = array<i32>} : memref<1x64x1xf32, #tpu.memory_space<vmem>>, vector<1x64x1xf32>,
    } else {
    }
    %c0 = arith.constant 0 : index
    %c0_1 = arith.constant 0 : index
    %3 = vector.load %arg4[%c0, %c0_1] : memref<64x3xf32, #tpu.memory_space<vmem>>, vector<64x3xf32>
    %c0_2 = arith.constant 0 : index
    %c0_3 = arith.constant 0 : index
    %4 = vector.load %arg5[%c0_2, %c0_3] : memref<64x1xf32, #tpu.memory_space<vmem>>, vector<64x1xf32>
    %c0_4 = arith.constant 0 : index
    %c0_5 = arith.constant 0 : index
    %c0_6 = arith.constant 0 : index
    %5 = vector.load %arg2[%c0_4, %c0_5, %c0_6] : memref<1x3x256xf32, #tpu.memory_space<vmem>>, vector<1x3x256xf32>
    %6 = vector.shape_cast %5 : vector<1x3x256xf32> to vector<3x256xf32>
    %cst = arith.constant dense<0.000000e+00> : vector<64x256xf32>
    %7 = tpu.matmul %3, %6, %cst {dimension_numbers = #tpu.dot_dimension_numbers<[1], [0], [0], [1], [0, 0, 1, 1], [], []>} : vector<64x3xf32>, vector<3x256xf32>, vector<64x256xf32> -> vector<64x256xf32>
    %8 = vector.broadcast %4 : vector<64x1xf32> to vector<64x256xf32>
    %9 = arith.addf %7, %8 : vector<64x256xf32>
    %cst_7 = arith.constant 0.000000e+00 : f32
    %10 = vector.broadcast %cst_7 : f32 to vector<64x256xf32>
    %11 = arith.maximumf %9, %10 : vector<64x256xf32>
    %c0_8 = arith.constant 0 : index
    %c0_9 = arith.constant 0 : index
    %c0_10 = arith.constant 0 : index
    %12 = vector.load %arg6[%c0_8, %c0_9, %c0_10] : memref<1x64x1xf32, #tpu.memory_space<vmem>>, vector<1x64x1xf32>
    %13 = vector.shape_cast %12 : vector<1x64x1xf32> to vector<64x1xf32>
    %cst_11 = arith.constant dense<0.000000e+00> : vector<64xf32>
    %14 = vector.multi_reduction <add>, %11, %cst_11 [1] : vector<64x256xf32> to vector<64xf32>
    %15 = vector.shape_cast %14 : vector<64xf32> to vector<64x1xf32>
    %16 = arith.addf %13, %15 : vector<64x1xf32>
    %c0_12 = arith.constant 0 : index
    %c0_13 = arith.constant 0 : index
    %c0_14 = arith.constant 0 : index
    %17 = vector.load %arg6[%c0_12, %c0_13, %c0_14] : memref<1x64x1xf32, #tpu.memory_space<vmem>>, vector<1x64x1xf32>
    %18 = vector.shape_cast %17 : vector<1x64x1xf32> to vector<64x1xf32>
    %19 = vector.shape_cast %16 : vector<64x1xf32> to vector<1x64x1xf32>
    tpu.vector_store %arg6[%c0_12, %c0_13, %c0_14], %19 {strides = array<i32>} : memref<1x64x1xf32, #tpu.memory_space<vmem>>, vector<1x64x1xf32>,
    %c0_15 = arith.constant 0 : index
    %c0_16 = arith.constant 0 : index
    %c0_17 = arith.constant 0 : index
    %20 = vector.load %arg7[%c0_15, %c0_16, %c0_17] : memref<1x64x1xf32, #tpu.memory_space<vmem>>, vector<1x64x1xf32>
    %21 = vector.shape_cast %20 : vector<1x64x1xf32> to vector<64x1xf32>
    %22 = arith.mulf %11, %11 : vector<64x256xf32>
    %cst_18 = arith.constant dense<0.000000e+00> : vector<64xf32>
    %23 = vector.multi_reduction <add>, %22, %cst_18 [1] : vector<64x256xf32> to vector<64xf32>
    %24 = vector.shape_cast %23 : vector<64xf32> to vector<64x1xf32>
    %25 = arith.addf %21, %24 : vector<64x1xf32>
    %c0_19 = arith.constant 0 : index
    %c0_20 = arith.constant 0 : index
    %c0_21 = arith.constant 0 : index
    %26 = vector.load %arg7[%c0_19, %c0_20, %c0_21] : memref<1x64x1xf32, #tpu.memory_space<vmem>>, vector<1x64x1xf32>
    %27 = vector.shape_cast %26 : vector<1x64x1xf32> to vector<64x1xf32>
    %28 = vector.shape_cast %25 : vector<64x1xf32> to vector<1x64x1xf32>
    tpu.vector_store %arg7[%c0_19, %c0_20, %c0_21], %28 {strides = array<i32>} : memref<1x64x1xf32, #tpu.memory_space<vmem>>, vector<1x64x1xf32>,
    %c0_22 = arith.constant 0 : index
    %c0_23 = arith.constant 0 : index
    %c0_24 = arith.constant 0 : index
    %29 = vector.load %arg3[%c0_22, %c0_23, %c0_24] : memref<1x3x256xf32, #tpu.memory_space<vmem>>, vector<1x3x256xf32>
    %30 = vector.shape_cast %29 : vector<1x3x256xf32> to vector<3x256xf32>
    %cst_25 = arith.constant dense<0.000000e+00> : vector<64x256xf32>
    %31 = tpu.matmul %3, %30, %cst_25 {dimension_numbers = #tpu.dot_dimension_numbers<[1], [0], [0], [1], [0, 0, 1, 1], [], []>} : vector<64x3xf32>, vector<3x256xf32>, vector<64x256xf32> -> vector<64x256xf32>
    %32 = vector.broadcast %4 : vector<64x1xf32> to vector<64x256xf32>
    %33 = arith.addf %31, %32 : vector<64x256xf32>
    %cst_26 = arith.constant 0.000000e+00 : f32
    %34 = vector.broadcast %cst_26 : f32 to vector<64x256xf32>
    %35 = arith.maximumf %33, %34 : vector<64x256xf32>
    %c0_27 = arith.constant 0 : index
    %c0_28 = arith.constant 0 : index
    %c0_29 = arith.constant 0 : index
    %36 = vector.load %arg8[%c0_27, %c0_28, %c0_29] : memref<1x64x1xf32, #tpu.memory_space<vmem>>, vector<1x64x1xf32>
    %37 = vector.shape_cast %36 : vector<1x64x1xf32> to vector<64x1xf32>
    %cst_30 = arith.constant dense<0.000000e+00> : vector<64xf32>
    %38 = vector.multi_reduction <add>, %35, %cst_30 [1] : vector<64x256xf32> to vector<64xf32>
    %39 = vector.shape_cast %38 : vector<64xf32> to vector<64x1xf32>
    %40 = arith.addf %37, %39 : vector<64x1xf32>
    %c0_31 = arith.constant 0 : index
    %c0_32 = arith.constant 0 : index
    %c0_33 = arith.constant 0 : index
    %41 = vector.load %arg8[%c0_31, %c0_32, %c0_33] : memref<1x64x1xf32, #tpu.memory_space<vmem>>, vector<1x64x1xf32>
    %42 = vector.shape_cast %41 : vector<1x64x1xf32> to vector<64x1xf32>
    %43 = vector.shape_cast %40 : vector<64x1xf32> to vector<1x64x1xf32>
    tpu.vector_store %arg8[%c0_31, %c0_32, %c0_33], %43 {strides = array<i32>} : memref<1x64x1xf32, #tpu.memory_space<vmem>>, vector<1x64x1xf32>,
    %c0_34 = arith.constant 0 : index
    %c0_35 = arith.constant 0 : index
    %c0_36 = arith.constant 0 : index
    %44 = vector.load %arg9[%c0_34, %c0_35, %c0_36] : memref<1x64x1xf32, #tpu.memory_space<vmem>>, vector<1x64x1xf32>
    %45 = vector.shape_cast %44 : vector<1x64x1xf32> to vector<64x1xf32>
    %46 = arith.mulf %35, %35 : vector<64x256xf32>
    %cst_37 = arith.constant dense<0.000000e+00> : vector<64xf32>
    %47 = vector.multi_reduction <add>, %46, %cst_37 [1] : vector<64x256xf32> to vector<64xf32>
    %48 = vector.shape_cast %47 : vector<64xf32> to vector<64x1xf32>
    %49 = arith.addf %45, %48 : vector<64x1xf32>
    %c0_38 = arith.constant 0 : index
    %c0_39 = arith.constant 0 : index
    %c0_40 = arith.constant 0 : index
    %50 = vector.load %arg9[%c0_38, %c0_39, %c0_40] : memref<1x64x1xf32, #tpu.memory_space<vmem>>, vector<1x64x1xf32>
    %51 = vector.shape_cast %50 : vector<1x64x1xf32> to vector<64x1xf32>
    %52 = vector.shape_cast %49 : vector<64x1xf32> to vector<1x64x1xf32>
    tpu.vector_store %arg9[%c0_38, %c0_39, %c0_40], %52 {strides = array<i32>} : memref<1x64x1xf32, #tpu.memory_space<vmem>>, vector<1x64x1xf32>,
    return
  }
  func.func @transform_0(%arg0: i32, %arg1: i32) -> (i32, i32, i32) {
    %c0_i32 = arith.constant 0 : i32
    %c0_i32_0 = arith.constant 0 : i32
    return %arg0, %c0_i32, %arg1 : i32, i32, i32
  }
  func.func @transform_1(%arg0: i32, %arg1: i32) -> (i32, i32, i32) {
    %c0_i32 = arith.constant 0 : i32
    %c0_i32_0 = arith.constant 0 : i32
    return %arg0, %c0_i32, %arg1 : i32, i32, i32
  }
  func.func @transform_2(%arg0: i32, %arg1: i32) -> (i32, i32) {
    %c0_i32 = arith.constant 0 : i32
    %c0_i32_0 = arith.constant 0 : i32
    %c0_i32_1 = arith.constant 0 : i32
    return %c0_i32, %c0_i32_0 : i32, i32
  }
  func.func @transform_3(%arg0: i32, %arg1: i32) -> (i32, i32) {
    %c0_i32 = arith.constant 0 : i32
    %c0_i32_0 = arith.constant 0 : i32
    %c0_i32_1 = arith.constant 0 : i32
    return %c0_i32, %c0_i32_0 : i32, i32
  }
  func.func @transform_4(%arg0: i32, %arg1: i32) -> (i32, i32, i32) {
    %c0_i32 = arith.constant 0 : i32
    %c0_i32_0 = arith.constant 0 : i32
    %c0_i32_1 = arith.constant 0 : i32
    return %arg0, %c0_i32, %c0_i32_0 : i32, i32, i32
  }
  func.func @transform_5(%arg0: i32, %arg1: i32) -> (i32, i32, i32) {
    %c0_i32 = arith.constant 0 : i32
    %c0_i32_0 = arith.constant 0 : i32
    %c0_i32_1 = arith.constant 0 : i32
    return %arg0, %c0_i32, %c0_i32_0 : i32, i32, i32
  }
  func.func @transform_6(%arg0: i32, %arg1: i32) -> (i32, i32, i32) {
    %c0_i32 = arith.constant 0 : i32
    %c0_i32_0 = arith.constant 0 : i32
    %c0_i32_1 = arith.constant 0 : i32
    return %arg0, %c0_i32, %c0_i32_0 : i32, i32, i32
  }
  func.func @transform_7(%arg0: i32, %arg1: i32) -> (i32, i32, i32) {
    %c0_i32 = arith.constant 0 : i32
    %c0_i32_0 = arith.constant 0 : i32
    %c0_i32_1 = arith.constant 0 : i32
    return %arg0, %c0_i32, %c0_i32_0 : i32, i32, i32
  }
}

</mosaic_0001>

<bundles_post_ra>
// kernel: tpu_custom_call.1
= control target key start
LH: loop header
LB: loop body
LE: loop exit
PB: predicated region body
PF: predicated region fallthrough
CT: control target
= control target key end

     0   :  { %s1323_s24 = smov 0   ;;  %s1325_s25 = smov 0   ;;  %s1694_s0 = inlined_call_operand.vmem [shape: f32[2,3,256], index: 0, kind: input, shape index: {}]   ;;  %s1695_s1 = inlined_call_operand.vmem [shape: f32[2,3,256], index: 1, kind: input, shape index: {}]   ;;  %s1696_s2 = inlined_call_operand.vmem [shape: f32[64,3], index: 2, kind: input, shape index: {}]   ;;  %s1697_s3 = inlined_call_operand.vmem [shape: f32[64,1], index: 3, kind: input, shape index: {}]   ;;  %s1698_s4 = inlined_call_operand.vmem [shape: f32[2,64,1], index: 4, kind: output, shape index: {0}]   ;;  %s1699_s5 = inlined_call_operand.vmem [shape: f32[2,64,1], index: 5, kind: output, shape index: {1}]   ;;  %s1700_s6 = inlined_call_operand.vmem [shape: f32[2,64,1], index: 6, kind: output, shape index: {2}]   ;;  %s1701_s7 = inlined_call_operand.vmem [shape: f32[2,64,1], index: 7, kind: output, shape index: {3}]  }
   0x1   :  { %s1327_s26 = smov 0  }
   0x2 LB: > { %s30_s27 = sadd.s32 1, %s1275_s25  ;;  %p1186_p0 = scmp.ge.s32.totalorder %s1279_s26, 1  ;;  %s1279_s26 = sphi %s1327_s26, %s18_s26   ;;  %s1275_s25 = sphi %s1325_s25, %s1703_s25   ;;  %s1271_s24 = sphi %s1323_s24, %s1702_s24  }
   0x3   : > { %p32_p1 = scmp.ge.s32.totalorder %s30_s27, 2  ;;  %p280_p2 = scmp.lt.s32.totalorder %s1279_s26, 3 }
   0x5   : > { %s1705_s27 = smov (%p32_p1, %s30_s27), 0  ;;  %p281_p3 = pnand %p1186_p0, %p280_p2 }
   0x6   : > { %p341_p4 = scmp.lt.s32.totalorder (!%p281_p3), %s1271_s24, 1  ;;  %v1281_v0 = vmov (!%p281_p3), 0.0   ;;  %v1282_v1 = vmov (!%p281_p3), 0   ;;  %v425_v2 = vld [vmem:[%s1697_s3] sm:$0xff] (!%p281_p3)  ;;  %v427_v3 = vld [vmem:[%s1697_s3 + $0x10] sm:$0xff] (!%p281_p3)  ;;  %v426_v4 = vld [vmem:[%s1697_s3 + $0x8] sm:$0xff] (!%p281_p3) }
   0x7   : > { %284 = sbr.rel (%p281_p3) target bundleno = 452 (0x1c4), region = 36  ;;  %570 = vmatprep.mubr.f32.mxu0 (!%p281_p3), %v1281_v0  ;;  %819 = vmatprep.mubr.f32.mxu1 (!%p281_p3), %v1281_v0  ;;  %vm501_vm0 = vcmask (!%p281_p3), 1042432   ;;  %v417_v9 = vld [vmem:[%s1696_s2] sm:$0xff] (!%p281_p3)  ;;  %vm476_vm1 = vcmask (!%p281_p3), 23552   ;;  %v428_v11 = vld [vmem:[%s1697_s3 + $0x18] sm:$0xff] (!%p281_p3)  ;;  %v418_v12 = vld [vmem:[%s1696_s2 + $0x8] sm:$0xff] (!%p281_p3) }
   0x8   : > { %1253 = vset.pattern.permute.xlu0 (!%p281_p3), %v1282_v1  ;;  %1254 = vset.pattern.permute.xlu1 (!%p281_p3), %v1282_v1  ;;  %v429_v10 = vld [vmem:[%s1697_s3 + $0x20] sm:$0xff] (!%p281_p3)  ;;  %v431_v13 = vld [vmem:[%s1697_s3 + $0x30] sm:$0xff] (!%p281_p3)  ;;  %v430_v14 = vld [vmem:[%s1697_s3 + $0x28] sm:$0xff] (!%p281_p3)  ;;  %vm384_vm2 = vcmask (!%p281_p3), 7168  }
   0x9   : > { %436 = vperm.xlu0 (!%p281_p3), %1253, %v425_v2   ;;  %446 = vperm.xlu1 (!%p281_p3), %1254, %v427_v3   ;;  %v419_v15 = vld [vmem:[%s1696_s2 + $0x10] sm:$0xff] (!%p281_p3)  ;;  %v432_v16 = vld [vmem:[%s1697_s3 + $0x38] sm:$0xff] (!%p281_p3)  ;;  %v421_v18 = vld [vmem:[%s1696_s2 + $0x20] sm:$0xff] (!%p281_p3) }
   0xa   : > { %v420_v17 = vld [vmem:[%s1696_s2 + $0x18] sm:$0xff] (!%p281_p3)  ;;  %v422_v19 = vld [vmem:[%s1696_s2 + $0x28] sm:$0xff] (!%p281_p3)  ;;  %v423_v20 = vld [vmem:[%s1696_s2 + $0x30] sm:$0xff] (!%p281_p3) }
   0xb   : > { %v424_v21 = vld [vmem:[%s1696_s2 + $0x38] sm:$0xff] (!%p281_p3) }
   0xd   : > { %441 = vperm.xlu0 (!%p281_p3), %1253, %v426_v4   ;;  %451 = vperm.xlu1 (!%p281_p3), %1254, %v428_v11  }
   0xe   : > { %s1707_s24 = smov (!%p341_p4, %s1271_s24), 1 }
   0xf   : > { %s1221_s30 = sshll.u32 %s1707_s24, 3  ;;  %s1431_s29 = sshll.u32 %s1707_s24, 6 }
  0x10   : > { %s348_s12 = scalar_lea.vmem %s1694_s0, %s1221_s30  ;;  %s358_s15 = scalar_lea.vmem %s1695_s1, %s1221_s30 }
  0x11   : > { %v433_v5 = vld [vmem:[%s348_s12] sm:$0x77]  ;;  %456 = vperm.xlu0 %1253, %v429_v10   ;;  %461 = vperm.xlu1 %1254, %v430_v14   ;;  %s1437_s9 = scalar_lea.vmem %s1700_s6, %s1431_s29  ;;  %s1477_s11 = scalar_lea.vmem %s1698_s4, %s1431_s29 }
  0x12   : > { %v748_v6 = vld [vmem:[%s358_s15] sm:$0x77]  ;;  %v475_v7 = vcombine.high %v433_v5, %v433_v5  ;;  %401 = vst.msk [vmem:[%s1437_s9] sm:$0xff] %vm384_vm2, %v1281_v0  ;;  %402 = vst.msk [vmem:[%s1437_s9 + $0x8] sm:$0xff] %vm384_vm2, %v1281_v0  ;;  %s1516_s14 = scalar_lea.vmem %s1699_s5, %s1431_s29  ;;  %s1554_s17 = scalar_lea.vmem %s1701_s7, %s1431_s29 }
  0x13   : > { %v750_v8 = vcombine.high %v748_v6, %v748_v6  ;;  %403 = vst.msk [vmem:[%s1437_s9 + $0x10] sm:$0xff] %vm384_vm2, %v1281_v0  ;;  %404 = vst.msk [vmem:[%s1437_s9 + $0x18] sm:$0xff] %vm384_vm2, %v1281_v0 }
  0x14   : > { %1199 = vmatprep.subr.msk.mxu0 %vm501_vm0, %v475_v7  ;;  %405 = vst.msk [vmem:[%s1437_s9 + $0x20] sm:$0xff] %vm384_vm2, %v1281_v0  ;;  %406 = vst.msk [vmem:[%s1437_s9 + $0x28] sm:$0xff] %vm384_vm2, %v1281_v0 }
  0x15   : > { %1209 = vmatprep.subr.msk.mxu1 %vm501_vm0, %v750_v8  ;;  %1200 = vmatpush1.msk.msra.mxu0 %vm501_vm0, %v433_v5  ;;  %407 = vst.msk [vmem:[%s1437_s9 + $0x30] sm:$0xff] %vm384_vm2, %v1281_v0  ;;  %408 = vst.msk [vmem:[%s1437_s9 + $0x38] sm:$0xff] %vm384_vm2, %v1281_v0 }
  0x16   : > { %1210 = vmatpush1.msk.msra.mxu1 %vm501_vm0, %v748_v6  ;;  %1201 = vmatmul.mubr.msk.f32.vlgmr.msra.gmra.mrb[0].mxu0 %vm476_vm1, %v417_v9  ;;  %385 = vst.msk [vmem:[%s1477_s11] sm:$0xff] %vm384_vm2, %v1281_v0  ;;  %386 = vst.msk [vmem:[%s1477_s11 + $0x8] sm:$0xff] %vm384_vm2, %v1281_v0 }
  0x17   : > { %1211 = vmatmul.mubr.msk.f32.vlgmr.msra.gmra.mrb[0].mxu1 %vm476_vm1, %v417_v9  ;;  %576 = vmatprep.mubr.f32.mxu0 %v1281_v0  ;;  %387 = vst.msk [vmem:[%s1477_s11 + $0x10] sm:$0xff] %vm384_vm2, %v1281_v0  ;;  %388 = vst.msk [vmem:[%s1477_s11 + $0x18] sm:$0xff] %vm384_vm2, %v1281_v0 }
  0x18   : > { %825 = vmatprep.mubr.f32.mxu1 %v1281_v0  ;;  %466 = vperm.xlu0 %1253, %v431_v13   ;;  %389 = vst.msk [vmem:[%s1477_s11 + $0x20] sm:$0xff] %vm384_vm2, %v1281_v0  ;;  %390 = vst.msk [vmem:[%s1477_s11 + $0x28] sm:$0xff] %vm384_vm2, %v1281_v0 }
  0x19   : > { %471 = vperm.xlu1 %1254, %v432_v16   ;;  %391 = vst.msk [vmem:[%s1477_s11 + $0x30] sm:$0xff] %vm384_vm2, %v1281_v0  ;;  %392 = vst.msk [vmem:[%s1477_s11 + $0x38] sm:$0xff] %vm384_vm2, %v1281_v0 }
  0x1a   : > { %1202 = vmatmul.mubr.msk.f32.gmra.mrb[2].mxu0 %vm476_vm1, %v418_v12  ;;  %393 = vst.msk [vmem:[%s1516_s14] sm:$0xff] %vm384_vm2, %v1281_v0  ;;  %394 = vst.msk [vmem:[%s1516_s14 + $0x8] sm:$0xff] %vm384_vm2, %v1281_v0 }
  0x1b   : > { %1212 = vmatmul.mubr.msk.f32.gmra.mrb[2].mxu1 %vm476_vm1, %v418_v12  ;;  %582 = vmatprep.mubr.f32.mxu0 %v1281_v0  ;;  %395 = vst.msk [vmem:[%s1516_s14 + $0x10] sm:$0xff] %vm384_vm2, %v1281_v0  ;;  %396 = vst.msk [vmem:[%s1516_s14 + $0x18] sm:$0xff] %vm384_vm2, %v1281_v0 }
  0x1c   : > { %831 = vmatprep.mubr.f32.mxu1 %v1281_v0  ;;  %397 = vst.msk [vmem:[%s1516_s14 + $0x20] sm:$0xff] %vm384_vm2, %v1281_v0  ;;  %398 = vst.msk [vmem:[%s1516_s14 + $0x28] sm:$0xff] %vm384_vm2, %v1281_v0 }
  0x1d   : > { %399 = vst.msk [vmem:[%s1516_s14 + $0x30] sm:$0xff] %vm384_vm2, %v1281_v0  ;;  %400 = vst.msk [vmem:[%s1516_s14 + $0x38] sm:$0xff] %vm384_vm2, %v1281_v0 }
  0x1e   : > { %1203 = vmatmul.mubr.msk.f32.gmra.mrb[4].mxu0 %vm476_vm1, %v419_v15  ;;  %409 = vst.msk [vmem:[%s1554_s17] sm:$0xff] %vm384_vm2, %v1281_v0  ;;  %410 = vst.msk [vmem:[%s1554_s17 + $0x8] sm:$0xff] %vm384_vm2, %v1281_v0 }
  0x1f   : > { %1213 = vmatmul.mubr.msk.f32.gmra.mrb[4].mxu1 %vm476_vm1, %v419_v15  ;;  %588 = vmatprep.mubr.f32.mxu0 %v1281_v0  ;;  %411 = vst.msk [vmem:[%s1554_s17 + $0x10] sm:$0xff] %vm384_vm2, %v1281_v0  ;;  %412 = vst.msk [vmem:[%s1554_s17 + $0x18] sm:$0xff] %vm384_vm2, %v1281_v0 }
  0x20   : > { %837 = vmatprep.mubr.f32.mxu1 %v1281_v0  ;;  %413 = vst.msk [vmem:[%s1554_s17 + $0x20] sm:$0xff] %vm384_vm2, %v1281_v0  ;;  %414 = vst.msk [vmem:[%s1554_s17 + $0x28] sm:$0xff] %vm384_vm2, %v1281_v0 }
  0x21   : > { %415 = vst.msk [vmem:[%s1554_s17 + $0x30] sm:$0xff] %vm384_vm2, %v1281_v0  ;;  %416 = vst.msk [vmem:[%s1554_s17 + $0x38] sm:$0xff] %vm384_vm2, %v1281_v0 }
  0x22   : > { %1204 = vmatmul.mubr.msk.f32.gmra.mrb[6].mxu0 %vm476_vm1, %v420_v17 }
  0x23   : > { %1214 = vmatmul.mubr.msk.f32.gmra.mrb[6].mxu1 %vm476_vm1, %v420_v17  ;;  %594 = vmatprep.mubr.f32.mxu0 %v1281_v0 }
  0x24   : > { %843 = vmatprep.mubr.f32.mxu1 %v1281_v0 }
  0x26   : > { %1205 = vmatmul.mubr.msk.f32.gmra.mrb[8].mxu0 %vm476_vm1, %v421_v18 }
  0x27   : > { %1215 = vmatmul.mubr.msk.f32.gmra.mrb[8].mxu1 %vm476_vm1, %v421_v18  ;;  %600 = vmatprep.mubr.f32.mxu0 %v1281_v0 }
  0x28   : > { %849 = vmatprep.mubr.f32.mxu1 %v1281_v0 }
  0x2a   : > { %1206 = vmatmul.mubr.msk.f32.gmra.mrb[10].mxu0 %vm476_vm1, %v422_v19 }
  0x2b   : > { %1216 = vmatmul.mubr.msk.f32.gmra.mrb[10].mxu1 %vm476_vm1, %v422_v19  ;;  %606 = vmatprep.mubr.f32.mxu0 %v1281_v0 }
  0x2c   : > { %855 = vmatprep.mubr.f32.mxu1 %v1281_v0 }
  0x2e   : > { %1207 = vmatmul.mubr.msk.f32.gmra.mrb[12].mxu0 %vm476_vm1, %v423_v20 }
  0x2f   : > { %1217 = vmatmul.mubr.msk.f32.gmra.mrb[12].mxu1 %vm476_vm1, %v423_v20  ;;  %612 = vmatprep.mubr.f32.mxu0 %v1281_v0 }
  0x30   : > { %861 = vmatprep.mubr.f32.mxu1 %v1281_v0 }
  0x32   : > { %1208 = vmatmul.mubr.msk.f32.gmra.mrb[14].mxu0 %vm476_vm1, %v424_v21 }
  0x33   : > { %1218 = vmatmul.mubr.msk.f32.gmra.mrb[14].mxu1 %vm476_vm1, %v424_v21 }
  0x88   : > { %v437_v22 = vpop.permute.xlu0 %436  ;;  %v447_v34 = vpop.permute.xlu1 %446 }
  0x8c   : > { %v442_v31 = vpop.permute.xlu0 %441  ;;  %v452_v5 = vpop.permute.xlu1 %451 }
  0xe9   : > { %v572_v23 = vpop.f32.mrb[0].mxu0 }
  0xea   : > { %v821_v24 = vpop.f32.mrb[0].mxu1  ;;  %v573_v25 = vadd.f32 %v572_v23, %v437_v22  ;;  %v574_v27 = vpop.f32.mrb[1].mxu0 }
  0xeb   : > { %v822_v26 = vadd.f32 %v821_v24, %v437_v22  ;;  %v823_v28 = vpop.f32.mrb[1].mxu1  ;;  %v575_v29 = vadd.f32 %v574_v27, %v437_v22 }
  0xec   : > { %v824_v30 = vadd.f32 %v823_v28, %v437_v22  ;;  %v619_v32 = vmax.f32 %v573_v25, 0.0  ;;  %v457_v25 = vpop.permute.xlu0 %456 }
  0xed   : > { %v868_v33 = vmax.f32 %v822_v26, 0.0  ;;  %v620_v35 = vmax.f32 %v575_v29, 0.0  ;;  %v578_v37 = vpop.f32.mrb[2].mxu0 }
  0xee   : > { %v869_v36 = vmax.f32 %v824_v30, 0.0  ;;  %v827_v38 = vpop.f32.mrb[2].mxu1  ;;  %v692_v39 = vmul.f32 %v619_v32, %v619_v32  ;;  %v579_v41 = vadd.f32 %v578_v37, %v442_v31  ;;  %v580_v43 = vpop.f32.mrb[3].mxu0 }
  0xef   : > { %v940_v40 = vmul.f32 %v868_v33, %v868_v33  ;;  %v828_v42 = vadd.f32 %v827_v38, %v442_v31  ;;  %v829_v44 = vpop.f32.mrb[3].mxu1  ;;  %v693_v45 = vmul.f32 %v620_v35, %v620_v35  ;;  %v581_v47 = vadd.f32 %v580_v43, %v442_v31 }
  0xf0   : > { %v941_v46 = vmul.f32 %v869_v36, %v869_v36  ;;  %v830_v48 = vadd.f32 %v829_v44, %v442_v31  ;;  %v621_v49 = vmax.f32 %v579_v41, 0.0  ;;  %v892_v51 = vadd.f32 %v869_v36, %v868_v33 }
  0xf1   : > { %v870_v50 = vmax.f32 %v828_v42, 0.0  ;;  %v643_v52 = vadd.f32 %v620_v35, %v619_v32  ;;  %v622_v53 = vmax.f32 %v581_v47, 0.0  ;;  %v584_v55 = vpop.f32.mrb[4].mxu0  ;;  %v708_v57 = vadd.f32 %v693_v45, %v692_v39  ;;  %v462_v45 = vpop.permute.xlu1 %461 }
  0xf2   : > { %v871_v54 = vmax.f32 %v830_v48, 0.0  ;;  %v833_v56 = vpop.f32.mrb[4].mxu1  ;;  %v956_v58 = vadd.f32 %v941_v46, %v940_v40  ;;  %v694_v59 = vmul.f32 %v621_v49, %v621_v49  ;;  %893 = vadd.xlane.f32.xlu1 %v892_v51  ;;  %v585_v61 = vadd.f32 %v584_v55, %v447_v34  ;;  %v586_v62 = vpop.f32.mrb[5].mxu0 }
  0xf3   : > { %v942_v60 = vmul.f32 %v870_v50, %v870_v50  ;;  %644 = vadd.xlane.f32.xlu0 %v643_v52  ;;  %v835_v63 = vpop.f32.mrb[5].mxu1  ;;  %v695_v1 = vmul.f32 %v622_v53, %v622_v53  ;;  %v834_v3 = vadd.f32 %v833_v56, %v447_v34  ;;  %v587_v7 = vadd.f32 %v586_v62, %v447_v34 }
  0xf4   : > { %v943_v2 = vmul.f32 %v871_v54, %v871_v54  ;;  %v895_v4 = vadd.f32 %v871_v54, %v870_v50  ;;  %v623_v6 = vmax.f32 %v585_v61, 0.0  ;;  %v836_v8 = vadd.f32 %v835_v63, %v447_v34 }
  0xf5   : > { %v1463_v9 = vadd.f32 %v622_v53, %v621_v49  ;;  %v872_v10 = vmax.f32 %v834_v3, 0.0  ;;  %v590_v11 = vpop.f32.mrb[6].mxu0  ;;  %v711_v13 = vadd.f32 %v695_v1, %v694_v59  ;;  %v624_v16 = vmax.f32 %v587_v7, 0.0  ;;  %v467_v3 = vpop.permute.xlu0 %466 }
  0xf6   : > { %v839_v12 = vpop.f32.mrb[6].mxu1  ;;  %v959_v14 = vadd.f32 %v943_v2, %v942_v60  ;;  %v696_v15 = vmul.f32 %v623_v6, %v623_v6  ;;  %709 = vadd.xlane.f32.xlu1 %v708_v57  ;;  %v873_v17 = vmax.f32 %v836_v8, 0.0  ;;  %v591_v18 = vadd.f32 %v590_v11, %v452_v5  ;;  %v592_v19 = vpop.f32.mrb[7].mxu0 }
  0xf7   : > { %896 = vadd.xlane.f32.xlu0 %v895_v4  ;;  %v841_v20 = vpop.f32.mrb[7].mxu1  ;;  %v944_v21 = vmul.f32 %v872_v10, %v872_v10  ;;  %v840_v22 = vadd.f32 %v839_v12, %v452_v5  ;;  %v593_v23 = vadd.f32 %v592_v19, %v452_v5  ;;  %v697_v26 = vmul.f32 %v624_v16, %v624_v16 }
  0xf8   : > { %v842_v24 = vadd.f32 %v841_v20, %v452_v5  ;;  %v945_v27 = vmul.f32 %v873_v17, %v873_v17  ;;  %v625_v28 = vmax.f32 %v591_v18, 0.0  ;;  %v1465_v29 = vadd.f32 %v873_v17, %v872_v10 }
  0xf9   : > { %v874_v30 = vmax.f32 %v840_v22, 0.0  ;;  %v626_v31 = vmax.f32 %v593_v23, 0.0  ;;  %v596_v33 = vpop.f32.mrb[8].mxu0  ;;  %v1467_v35 = vadd.f32 %v624_v16, %v623_v6  ;;  %v1479_v49 = vadd.f32 %v697_v26, %v696_v15  ;;  %v472_v23 = vpop.permute.xlu1 %471 }
  0xfa   : > { %v875_v32 = vmax.f32 %v842_v24, 0.0  ;;  %v845_v34 = vpop.f32.mrb[8].mxu1  ;;  %v698_v36 = vmul.f32 %v625_v28, %v625_v28  ;;  %v597_v37 = vadd.f32 %v596_v33, %v457_v25  ;;  %957 = vadd.xlane.f32.xlu1 %v956_v58  ;;  %v598_v39 = vpop.f32.mrb[9].mxu0  ;;  %v1507_v54 = vadd.f32 %v945_v27, %v944_v21 }
  0xfb   : > { %v846_v38 = vadd.f32 %v845_v34, %v457_v25  ;;  %712 = vadd.xlane.f32.xlu0 %v711_v13  ;;  %v847_v40 = vpop.f32.mrb[9].mxu1  ;;  %v1469_v41 = vmul.f32 %v874_v30, %v874_v30  ;;  %v699_v42 = vmul.f32 %v626_v31, %v626_v31  ;;  %v599_v44 = vadd.f32 %v598_v39, %v457_v25 }
  0xfc   : > { %v1471_v43 = vmul.f32 %v875_v32, %v875_v32  ;;  %v627_v46 = vmax.f32 %v597_v37, 0.0  ;;  %v848_v48 = vadd.f32 %v847_v40, %v457_v25  ;;  %v1505_v53 = vadd.f32 %v626_v31, %v625_v28 }
  0xfd   : > { %v876_v47 = vmax.f32 %v846_v38, 0.0  ;;  %v628_v50 = vmax.f32 %v599_v44, 0.0  ;;  %v602_v51 = vpop.f32.mrb[10].mxu0  ;;  %v1509_v55 = vadd.f32 %v875_v32, %v874_v30  ;;  %v1520_v7 = vadd.f32 %v699_v42, %v698_v36 }
  0xfe   : > { %v851_v52 = vpop.f32.mrb[10].mxu1  ;;  %v700_v56 = vmul.f32 %v627_v46, %v627_v46  ;;  %v877_v58 = vmax.f32 %v848_v48, 0.0  ;;  %v603_v59 = vadd.f32 %v602_v51, %v462_v45  ;;  %647 = vadd.xlane.f32.xlu1 %v1463_v9  ;;  %v604_v60 = vpop.f32.mrb[11].mxu0  ;;  %v965_v27 = vadd.f32 %v1471_v43, %v1469_v41 }
  0xff   : > { %v948_v57 = vmul.f32 %v876_v47, %v876_v47  ;;  %960 = vadd.xlane.f32.xlu0 %v959_v14  ;;  %v853_v61 = vpop.f32.mrb[11].mxu1  ;;  %v701_v62 = vmul.f32 %v628_v50, %v628_v50  ;;  %v852_v63 = vadd.f32 %v851_v52, %v462_v45  ;;  %v605_v1 = vadd.f32 %v604_v60, %v462_v45 }
 0x100   : > { %v854_v2 = vadd.f32 %v853_v61, %v462_v45  ;;  %v949_v4 = vmul.f32 %v877_v58, %v877_v58  ;;  %v629_v5 = vmax.f32 %v603_v59, 0.0  ;;  %v1518_v6 = vadd.f32 %v628_v50, %v627_v46 }
 0x101   : > { %v878_v8 = vmax.f32 %v852_v63, 0.0  ;;  %v630_v9 = vmax.f32 %v605_v1, 0.0  ;;  %v608_v11 = vpop.f32.mrb[12].mxu0  ;;  %v1546_v13 = vadd.f32 %v877_v58, %v876_v47  ;;  %v720_v31 = vadd.f32 %v701_v62, %v700_v56 }
 0x102   : > { %v879_v10 = vmax.f32 %v854_v2, 0.0  ;;  %v857_v12 = vpop.f32.mrb[12].mxu1  ;;  %v702_v14 = vmul.f32 %v629_v5, %v629_v5  ;;  %v609_v15 = vadd.f32 %v608_v11, %v467_v3  ;;  %899 = vadd.xlane.f32.xlu1 %v1465_v29  ;;  %v610_v17 = vpop.f32.mrb[13].mxu0  ;;  %v968_v33 = vadd.f32 %v949_v4, %v948_v57 }
 0x103   : > { %v858_v16 = vadd.f32 %v857_v12, %v467_v3  ;;  %650 = vadd.xlane.f32.xlu0 %v1467_v35  ;;  %v859_v18 = vpop.f32.mrb[13].mxu1  ;;  %v950_v19 = vmul.f32 %v878_v8, %v878_v8  ;;  %v703_v20 = vmul.f32 %v630_v9, %v630_v9  ;;  %v611_v22 = vadd.f32 %v610_v17, %v467_v3  ;;  %v932_v12 = vld [vmem:[%s1554_s17] sm:$0xff] }
 0x104   : > { %v951_v21 = vmul.f32 %v879_v10, %v879_v10  ;;  %v631_v24 = vmax.f32 %v609_v15, 0.0  ;;  %v860_v26 = vadd.f32 %v859_v18, %v467_v3  ;;  %v658_v32 = vadd.f32 %v630_v9, %v629_v5  ;;  %v636_v18 = vld [vmem:[%s1477_s11 + $0x8] sm:$0xff] }
 0x105   : > { %v880_v25 = vmax.f32 %v858_v16, 0.0  ;;  %v632_v28 = vmax.f32 %v611_v22, 0.0  ;;  %v614_v29 = vpop.f32.mrb[14].mxu0  ;;  %v907_v45 = vadd.f32 %v879_v10, %v878_v8  ;;  %v723_v51 = vadd.f32 %v703_v20, %v702_v14 }
 0x106   : > { %v863_v30 = vpop.f32.mrb[14].mxu1  ;;  %v704_v34 = vmul.f32 %v631_v24, %v631_v24  ;;  %v881_v36 = vmax.f32 %v860_v26, 0.0  ;;  %v615_v37 = vadd.f32 %v614_v29, %v472_v23  ;;  %715 = vadd.xlane.f32.xlu1 %v1479_v49  ;;  %v616_v38 = vpop.f32.mrb[15].mxu0 }
 0x107   : > { %v952_v35 = vmul.f32 %v880_v25, %v880_v25  ;;  %653 = vadd.xlane.f32.xlu0 %v1505_v53  ;;  %v865_v39 = vpop.f32.mrb[15].mxu1  ;;  %v705_v40 = vmul.f32 %v632_v28, %v632_v28  ;;  %v864_v41 = vadd.f32 %v863_v30, %v472_v23  ;;  %v617_v42 = vadd.f32 %v616_v38, %v472_v23  ;;  %v686_v30 = vld [vmem:[%s1516_s14 + $0x10] sm:$0xff] }
 0x108   : > { %v866_v0 = vadd.f32 %v865_v39, %v472_v23  ;;  %v953_v43 = vmul.f32 %v881_v36, %v881_v36  ;;  %v633_v44 = vmax.f32 %v615_v37, 0.0  ;;  %v661_v46 = vadd.f32 %v632_v28, %v631_v24  ;;  %v886_v24 = vld [vmem:[%s1437_s9 + $0x10] sm:$0xff]  ;;  %v887_v37 = vld [vmem:[%s1437_s9 + $0x18] sm:$0xff] }
 0x109   : > { %v882_v47 = vmax.f32 %v864_v41, 0.0  ;;  %v634_v48 = vmax.f32 %v617_v42, 0.0  ;;  %v910_v49 = vadd.f32 %v881_v36, %v880_v25  ;;  %v971_v53 = vadd.f32 %v951_v21, %v950_v19  ;;  %v933_v19 = vld [vmem:[%s1554_s17 + $0x8] sm:$0xff]  ;;  %v637_v25 = vld [vmem:[%s1477_s11 + $0x10] sm:$0xff]  ;;  %v639_v42 = vld [vmem:[%s1477_s11 + $0x20] sm:$0xff] }
 0x10a   : > { %v883_v50 = vmax.f32 %v866_v0, 0.0  ;;  %v706_v52 = vmul.f32 %v633_v44, %v633_v44  ;;  %963 = vadd.xlane.f32.xlu1 %v1507_v54  ;;  %v726_v59 = vadd.f32 %v705_v40, %v704_v34  ;;  %v974_v61 = vadd.f32 %v953_v43, %v952_v35  ;;  %v884_v54 = vld [vmem:[%s1437_s9] sm:$0xff]  ;;  %v934_v36 = vld [vmem:[%s1554_s17 + $0x10] sm:$0xff]  ;;  %v687_v0 = vld [vmem:[%s1516_s14 + $0x18] sm:$0xff] }
 0x10b   : > { %902 = vadd.xlane.f32.xlu0 %v1509_v55  ;;  %v954_v56 = vmul.f32 %v882_v47, %v882_v47  ;;  %v707_v57 = vmul.f32 %v634_v48, %v634_v48  ;;  %v664_v60 = vadd.f32 %v634_v48, %v633_v44  ;;  %v635_v55 = vld [vmem:[%s1477_s11] sm:$0xff]  ;;  %v935_v48 = vld [vmem:[%s1554_s17 + $0x18] sm:$0xff] }
 0x10c   : > { %v955_v58 = vmul.f32 %v883_v50, %v883_v50  ;;  %v913_v62 = vadd.f32 %v883_v50, %v882_v47  ;;  %v888_v47 = vld [vmem:[%s1437_s9 + $0x20] sm:$0xff] }
 0x10d   : > { %v729_v63 = vadd.f32 %v707_v57, %v706_v52 }
 0x10e   : > { %v977_v1 = vadd.f32 %v955_v58, %v954_v56  ;;  %656 = vadd.xlane.f32.xlu1 %v1518_v6  ;;  %v684_v6 = vld [vmem:[%s1516_s14] sm:$0xff]  ;;  %v640_v56 = vld [vmem:[%s1477_s11 + $0x28] sm:$0xff] }
 0x10f   : > { %718 = vadd.xlane.f32.xlu0 %v1520_v7  ;;  %v885_v7 = vld [vmem:[%s1437_s9 + $0x8] sm:$0xff] }
 0x112   : > { %905 = vadd.xlane.f32.xlu1 %v1546_v13  ;;  %v685_v13 = vld [vmem:[%s1516_s14 + $0x8] sm:$0xff] }
 0x113   : > { %966 = vadd.xlane.f32.xlu0 %v965_v27 }
 0x116   : > { %721 = vadd.xlane.f32.xlu1 %v720_v31  ;;  %v638_v31 = vld [vmem:[%s1477_s11 + $0x18] sm:$0xff] }
 0x117   : > { %659 = vadd.xlane.f32.xlu0 %v658_v32 }
 0x11a   : > { %969 = vadd.xlane.f32.xlu1 %v968_v33 }
 0x11b   : > { %908 = vadd.xlane.f32.xlu0 %v907_v45 }
 0x11e   : > { %662 = vadd.xlane.f32.xlu1 %v661_v46 }
 0x11f   : > { %724 = vadd.xlane.f32.xlu0 %v723_v51 }
 0x122   : > { %911 = vadd.xlane.f32.xlu1 %v910_v49 }
 0x123   : > { %972 = vadd.xlane.f32.xlu0 %v971_v53  ;;  %v688_v53 = vld [vmem:[%s1516_s14 + $0x20] sm:$0xff] }
 0x126   : > { %727 = vadd.xlane.f32.xlu1 %v726_v59 }
 0x127   : > { %665 = vadd.xlane.f32.xlu0 %v664_v60 }
 0x12a   : > { %975 = vadd.xlane.f32.xlu1 %v974_v61  ;;  %v936_v61 = vld [vmem:[%s1554_s17 + $0x20] sm:$0xff] }
 0x12b   : > { %914 = vadd.xlane.f32.xlu0 %v913_v62  ;;  %v889_v62 = vld [vmem:[%s1437_s9 + $0x28] sm:$0xff] }
 0x12f   : > { %730 = vadd.xlane.f32.xlu0 %v729_v63 }
 0x133   : > { %978 = vadd.xlane.f32.xlu0 %v977_v1 }
 0x17f   : > { %v894_v2 = vpop.xlane.xlu1 %893 }
 0x180   : > { %v645_v3 = vpop.xlane.xlu0 %644  ;;  %v916_v4 = vadd.f32 %v894_v2, %v884_v54  ;;  %v641_v2 = vld [vmem:[%s1477_s11 + $0x30] sm:$0xff] }
 0x181   : > { %v667_v5 = vadd.f32 %v645_v3, %v635_v55  ;;  %v689_v3 = vld [vmem:[%s1516_s14 + $0x28] sm:$0xff] }
 0x182   : > { %924 = vst.msk [vmem:[%s1437_s9] sm:$0xff] %vm384_vm2, %v916_v4 }
 0x183   : > { %676 = vst.msk [vmem:[%s1477_s11] sm:$0xff] %vm384_vm2, %v667_v5  ;;  %v710_v8 = vpop.xlane.xlu1 %709 }
 0x184   : > { %v897_v9 = vpop.xlane.xlu0 %896  ;;  %v732_v10 = vadd.f32 %v710_v8, %v684_v6  ;;  %v890_v8 = vld [vmem:[%s1437_s9 + $0x30] sm:$0xff] }
 0x185   : > { %v917_v11 = vadd.f32 %v897_v9, %v885_v7  ;;  %v937_v9 = vld [vmem:[%s1554_s17 + $0x28] sm:$0xff] }
 0x186   : > { %740 = vst.msk [vmem:[%s1516_s14] sm:$0xff] %vm384_vm2, %v732_v10 }
 0x187   : > { %925 = vst.msk [vmem:[%s1437_s9 + $0x8] sm:$0xff] %vm384_vm2, %v917_v11  ;;  %v958_v14 = vpop.xlane.xlu1 %957 }
 0x188   : > { %v713_v15 = vpop.xlane.xlu0 %712  ;;  %v980_v16 = vadd.f32 %v958_v14, %v932_v12  ;;  %v690_v14 = vld [vmem:[%s1516_s14 + $0x30] sm:$0xff] }
 0x189   : > { %v733_v17 = vadd.f32 %v713_v15, %v685_v13  ;;  %v642_v15 = vld [vmem:[%s1477_s11 + $0x38] sm:$0xff] }
 0x18a   : > { %988 = vst.msk [vmem:[%s1554_s17] sm:$0xff] %vm384_vm2, %v980_v16 }
 0x18b   : > { %741 = vst.msk [vmem:[%s1516_s14 + $0x8] sm:$0xff] %vm384_vm2, %v733_v17  ;;  %v648_v20 = vpop.xlane.xlu1 %647 }
 0x18c   : > { %v961_v21 = vpop.xlane.xlu0 %960  ;;  %v668_v22 = vadd.f32 %v648_v20, %v636_v18  ;;  %v938_v20 = vld [vmem:[%s1554_s17 + $0x30] sm:$0xff] }
 0x18d   : > { %v981_v23 = vadd.f32 %v961_v21, %v933_v19  ;;  %v891_v21 = vld [vmem:[%s1437_s9 + $0x38] sm:$0xff] }
 0x18e   : > { %677 = vst.msk [vmem:[%s1477_s11 + $0x8] sm:$0xff] %vm384_vm2, %v668_v22 }
 0x18f   : > { %989 = vst.msk [vmem:[%s1554_s17 + $0x8] sm:$0xff] %vm384_vm2, %v981_v23  ;;  %v900_v26 = vpop.xlane.xlu1 %899 }
 0x190   : > { %v651_v27 = vpop.xlane.xlu0 %650  ;;  %v918_v28 = vadd.f32 %v900_v26, %v886_v24  ;;  %v691_v26 = vld [vmem:[%s1516_s14 + $0x38] sm:$0xff] }
 0x191   : > { %v669_v29 = vadd.f32 %v651_v27, %v637_v25 }
 0x192   : > { %926 = vst.msk [vmem:[%s1437_s9 + $0x10] sm:$0xff] %vm384_vm2, %v918_v28 }
 0x193   : > { %678 = vst.msk [vmem:[%s1477_s11 + $0x10] sm:$0xff] %vm384_vm2, %v669_v29  ;;  %v716_v32 = vpop.xlane.xlu1 %715  ;;  %v939_v29 = vld [vmem:[%s1554_s17 + $0x38] sm:$0xff] }
 0x194   : > { %v654_v33 = vpop.xlane.xlu0 %653  ;;  %v734_v34 = vadd.f32 %v716_v32, %v686_v30 }
 0x195   : > { %v670_v35 = vadd.f32 %v654_v33, %v638_v31 }
 0x196   : > { %742 = vst.msk [vmem:[%s1516_s14 + $0x10] sm:$0xff] %vm384_vm2, %v734_v34 }
 0x197   : > { %679 = vst.msk [vmem:[%s1477_s11 + $0x18] sm:$0xff] %vm384_vm2, %v670_v35  ;;  %v964_v38 = vpop.xlane.xlu1 %963 }
 0x198   : > { %v903_v39 = vpop.xlane.xlu0 %902  ;;  %v982_v40 = vadd.f32 %v964_v38, %v934_v36 }
 0x199   : > { %v919_v41 = vadd.f32 %v903_v39, %v887_v37 }
 0x19a   : > { %990 = vst.msk [vmem:[%s1554_s17 + $0x10] sm:$0xff] %vm384_vm2, %v982_v40 }
 0x19b   : > { %927 = vst.msk [vmem:[%s1437_s9 + $0x18] sm:$0xff] %vm384_vm2, %v919_v41  ;;  %v657_v43 = vpop.xlane.xlu1 %656 }
 0x19c   : > { %v719_v44 = vpop.xlane.xlu0 %718  ;;  %v671_v45 = vadd.f32 %v657_v43, %v639_v42 }
 0x19d   : > { %v735_v46 = vadd.f32 %v719_v44, %v687_v0 }
 0x19e   : > { %680 = vst.msk [vmem:[%s1477_s11 + $0x20] sm:$0xff] %vm384_vm2, %v671_v45 }
 0x19f   : > { %743 = vst.msk [vmem:[%s1516_s14 + $0x18] sm:$0xff] %vm384_vm2, %v735_v46  ;;  %v906_v50 = vpop.xlane.xlu1 %905 }
 0x1a0   : > { %v967_v51 = vpop.xlane.xlu0 %966  ;;  %v920_v52 = vadd.f32 %v906_v50, %v888_v47 }
 0x1a1   : > { %v983_v49 = vadd.f32 %v967_v51, %v935_v48 }
 0x1a2   : > { %928 = vst.msk [vmem:[%s1437_s9 + $0x20] sm:$0xff] %vm384_vm2, %v920_v52 }
 0x1a3   : > { %991 = vst.msk [vmem:[%s1554_s17 + $0x18] sm:$0xff] %vm384_vm2, %v983_v49  ;;  %v722_v57 = vpop.xlane.xlu1 %721 }
 0x1a4   : > { %v660_v58 = vpop.xlane.xlu0 %659  ;;  %v736_v59 = vadd.f32 %v722_v57, %v688_v53 }
 0x1a5   : > { %v672_v60 = vadd.f32 %v660_v58, %v640_v56 }
 0x1a6   : > { %744 = vst.msk [vmem:[%s1516_s14 + $0x20] sm:$0xff] %vm384_vm2, %v736_v59 }
 0x1a7   : > { %681 = vst.msk [vmem:[%s1477_s11 + $0x28] sm:$0xff] %vm384_vm2, %v672_v60  ;;  %v970_v63 = vpop.xlane.xlu1 %969 }
 0x1a8   : > { %v909_v1 = vpop.xlane.xlu0 %908  ;;  %v984_v54 = vadd.f32 %v970_v63, %v936_v61 }
 0x1a9   : > { %v921_v55 = vadd.f32 %v909_v1, %v889_v62 }
 0x1aa   : > { %992 = vst.msk [vmem:[%s1554_s17 + $0x20] sm:$0xff] %vm384_vm2, %v984_v54 }
 0x1ab   : > { %929 = vst.msk [vmem:[%s1437_s9 + $0x28] sm:$0xff] %vm384_vm2, %v921_v55  ;;  %v663_v4 = vpop.xlane.xlu1 %662 }
 0x1ac   : > { %v725_v5 = vpop.xlane.xlu0 %724  ;;  %v673_v6 = vadd.f32 %v663_v4, %v641_v2 }
 0x1ad   : > { %v737_v7 = vadd.f32 %v725_v5, %v689_v3 }
 0x1ae   : > { %682 = vst.msk [vmem:[%s1477_s11 + $0x30] sm:$0xff] %vm384_vm2, %v673_v6 }
 0x1af   : > { %745 = vst.msk [vmem:[%s1516_s14 + $0x28] sm:$0xff] %vm384_vm2, %v737_v7  ;;  %v912_v10 = vpop.xlane.xlu1 %911 }
 0x1b0   : > { %v973_v11 = vpop.xlane.xlu0 %972  ;;  %v922_v12 = vadd.f32 %v912_v10, %v890_v8 }
 0x1b1   : > { %v985_v13 = vadd.f32 %v973_v11, %v937_v9 }
 0x1b2   : > { %930 = vst.msk [vmem:[%s1437_s9 + $0x30] sm:$0xff] %vm384_vm2, %v922_v12 }
 0x1b3   : > { %993 = vst.msk [vmem:[%s1554_s17 + $0x28] sm:$0xff] %vm384_vm2, %v985_v13  ;;  %v728_v16 = vpop.xlane.xlu1 %727 }
 0x1b4   : > { %v666_v17 = vpop.xlane.xlu0 %665  ;;  %v738_v18 = vadd.f32 %v728_v16, %v690_v14 }
 0x1b5   : > { %v674_v19 = vadd.f32 %v666_v17, %v642_v15 }
 0x1b6   : > { %746 = vst.msk [vmem:[%s1516_s14 + $0x30] sm:$0xff] %vm384_vm2, %v738_v18 }
 0x1b7   : > { %683 = vst.msk [vmem:[%s1477_s11 + $0x38] sm:$0xff] %vm384_vm2, %v674_v19  ;;  %v976_v22 = vpop.xlane.xlu1 %975 }
 0x1b8   : > { %v915_v23 = vpop.xlane.xlu0 %914  ;;  %v986_v24 = vadd.f32 %v976_v22, %v938_v20 }
 0x1b9   : > { %v923_v25 = vadd.f32 %v915_v23, %v891_v21 }
 0x1ba   : > { %994 = vst.msk [vmem:[%s1554_s17 + $0x30] sm:$0xff] %vm384_vm2, %v986_v24 }
 0x1bb   : > { %931 = vst.msk [vmem:[%s1437_s9 + $0x38] sm:$0xff] %vm384_vm2, %v923_v25 }
 0x1bc   : > { %v731_v27 = vpop.xlane.xlu0 %730 }
 0x1bd   : > { %v739_v28 = vadd.f32 %v731_v27, %v691_v26 }
 0x1bf   : > { %747 = vst.msk [vmem:[%s1516_s14 + $0x38] sm:$0xff] %vm384_vm2, %v739_v28 }
 0x1c0   : > { %v979_v30 = vpop.xlane.xlu0 %978 }
 0x1c1   : > { %v987_v31 = vadd.f32 %v979_v30, %v939_v29 }
 0x1c3   : > { %995 = vst.msk [vmem:[%s1554_s17 + $0x38] sm:$0xff] %vm384_vm2, %v987_v31 }
 0x1c4 PF: > { %s18_s26 = sadd.s32 1, %s1279_s26   ;;  %s1702_s24 = smov %s1275_s25 }
 0x1c5   : > { %p15_p5 = scmp.ge.s32.totalorder %s18_s26, 4   ;;  %s1703_s25 = smov %s1705_s27 }
 0x1c7   :  { %17 = sbr.rel (!%p15_p5) target bundleno = 2 (0x2), region = 109 }

</bundles_post_ra>
